<compile_context>
chip_gen: v5e
topology: v5e:2x2
jax: 0.10.0
libtpu: 0.0.40
codegen_flags: <defaults>
</compile_context>

<pallas_src>
import functools

import jax
import jax.numpy as jnp
from jax import lax
from jax.experimental import pallas as pl
from jax.experimental.pallas import tpu as pltpu

_SUBLANE = 8
# Per-step VMEM budget for the double-buffered inputs (2 logits + labels).
_INPUT_VMEM_BUDGET = 20 * 1024 * 1024
_VMEM_LIMIT_BYTES = 32 * 1024 * 1024
_MAX_TILE_ROWS = 1024


def _round_up(x, m):
    return ((x + m - 1) // m) * m


def _pick_tile_rows(n, c, itemsize):
    """Largest multiple-of-8 row tile whose double-buffered inputs fit the budget."""
    per_row_bytes = 2 * 2 * c * itemsize + 2 * 2 * 4  # 2 logits blocks + labels, x2 buffers
    tm = _INPUT_VMEM_BUDGET // per_row_bytes
    tm = max(_SUBLANE, (tm // _SUBLANE) * _SUBLANE)
    tm = min(tm, _MAX_TILE_ROWS, _round_up(n, _SUBLANE))
    return int(tm)


def _ce_pair_kernel(mol_ref, prop_ref, lab_ref, out_ref, *, n_total):
    # mol_ref/prop_ref: (TM, C) logits tile; lab_ref: (TM, 1) int32 tile;
    # out_ref: (1, 1) f32, constant block index -> resident accumulator.
    pid = pl.program_id(0)
    last = pl.num_programs(0) - 1
    tm, c = mol_ref.shape

    @pl.when(pid == 0)
    def _init():
        out_ref[...] = jnp.zeros_like(out_ref)

    # Mask rows past the true batch size (ragged last tile).
    row = pid * tm + lax.broadcasted_iota(jnp.int32, (tm, 1), 0)      # (TM, 1)
    valid = row < n_total                                             # (TM, 1) bool

    labels = lab_ref[...]                                             # (TM, 1) int32
    col = lax.broadcasted_iota(jnp.int32, (tm, c), 1)                 # (TM, C)
    label_mask = col == labels                                        # (TM, C) bool

    def _tile_nll_sum(x_ref):
        x = x_ref[...].astype(jnp.float32)                            # (TM, C)
        m = jnp.max(x, axis=-1, keepdims=True)                        # (TM, 1)
        lse = m + jnp.log(jnp.sum(jnp.exp(x - m), axis=-1, keepdims=True))
        x_lab = jnp.sum(jnp.where(label_mask, x, 0.0), axis=-1, keepdims=True)
        nll = jnp.where(valid, lse - x_lab, 0.0)                      # (TM, 1)
        return jnp.sum(nll, axis=0, keepdims=True)                    # (1, 1)

    out_ref[...] += _tile_nll_sum(mol_ref)[:, :1] + _tile_nll_sum(prop_ref)[:, :1]

    @pl.when(pid == last)
    def _finalize():
        # Mean over the *global* batch, then average of the two losses.
        out_ref[...] = out_ref[...] * (0.5 / n_total)


def contrastive_loss(molecule_embedding, properties_embedding, labels, *, tile_rows=None):
    n, c = molecule_embedding.shape
    assert properties_embedding.shape == (n, c)
    itemsize = jnp.dtype(molecule_embedding.dtype).itemsize

    if tile_rows is None:
        tm = _pick_tile_rows(n, c, itemsize)
    else:
        tm = min(_round_up(int(tile_rows), _SUBLANE), _round_up(n, _SUBLANE))
    grid = (pl.cdiv(n, tm),)

    labels2d = labels.astype(jnp.int32).reshape(n, 1)
    kernel = functools.partial(_ce_pair_kernel, n_total=n)

    cost = pl.CostEstimate(
        flops=12 * n * c,
        transcendentals=2 * n * c,
        bytes_accessed=2 * n * c * itemsize + n * 4 + 4,
    )

    out = pl.pallas_call(
        kernel,
        out_shape=jax.ShapeDtypeStruct((1, 1), jnp.float32),
        grid=grid,
        in_specs=[
            pl.BlockSpec((tm, c), lambda i: (i, 0)),
            pl.BlockSpec((tm, c), lambda i: (i, 0)),
            pl.BlockSpec((tm, 1), lambda i: (i, 0)),
        ],
        # Constant block index: output stays resident in VMEM for the whole
        # grid (accumulator) and is written back to HBM once at the end.
        out_specs=pl.BlockSpec((1, 1), lambda i: (0, 0)),
        compiler_params=pltpu.CompilerParams(
            dimension_semantics=("arbitrary",),   # reduction axis (carried accumulator)
            vmem_limit_bytes=_VMEM_LIMIT_BYTES,
        ),
        cost_estimate=cost,
    )(molecule_embedding, properties_embedding, labels2d)
    return out[0, 0]


def _reference_loss(mol, prop, labels):
    # Pure-JAX reference mirroring F.cross_entropy with class-index targets.
    def ce(x):
        logp = jax.nn.log_softmax(x.astype(jnp.float32), axis=-1)
        return -jnp.mean(logp[jnp.arange(x.shape[0]), labels])
    return (ce(mol) + ce(prop)) / 2.0


if __name__ == "__main__":
    key = jax.random.PRNGKey(0)
    k1, k2, k3 = jax.random.split(key, 3)

    N, C = 20, 128  # small, with N not a multiple of 8 to exercise the ragged-tile mask
    molecule_embedding = jax.random.normal(k1, (N, C), dtype=jnp.float32)
    properties_embedding = jax.random.normal(k2, (N, C), dtype=jnp.float32)
    labels = jax.random.randint(k3, (N,), 0, C, dtype=jnp.int32)

    ref = _reference_loss(molecule_embedding, properties_embedding, labels)

    # Forced small tile -> multi-step grid + ragged (masked) last tile.
    loss_tiled = contrastive_loss(
        molecule_embedding, properties_embedding, labels, tile_rows=8)
    jax.block_until_ready(loss_tiled)
    assert jnp.allclose(loss_tiled, ref, atol=1e-5, rtol=1e-5), (loss_tiled, ref)

    # Automatic tile selection (single tile at this toy size).
    loss_auto = contrastive_loss(molecule_embedding, properties_embedding, labels)
    jax.block_until_ready(loss_auto)
    assert jnp.allclose(loss_auto, ref, atol=1e-5, rtol=1e-5), (loss_auto, ref)

    print("KERNEL_OK")
</pallas_src>

<mosaic_0001>
module attributes {stable_mosaic.version = 11 : i64} {
  func.func @_ce_pair_kernel(%arg0: i32, %arg1: memref<8x128xf32, #tpu.memory_space<vmem>>, %arg2: memref<8x128xf32, #tpu.memory_space<vmem>>, %arg3: memref<8x1xi32, #tpu.memory_space<vmem>>, %arg4: memref<1x1xf32, #tpu.memory_space<vmem>>) attributes {dimension_semantics = [#tpu.dimension_semantics<arbitrary>], iteration_bounds = array<i64: 3>, scalar_prefetch = 0 : i64, scratch_operands = 0 : i64, tpu.core_type = #tpu.core_type<tc>, window_params = [{transform_indices = @transform_0, window_bounds = array<i64: 8, 128>}, {transform_indices = @transform_1, window_bounds = array<i64: 8, 128>}, {transform_indices = @transform_2, window_bounds = array<i64: 8, 1>}, {pipeline_mode = #tpu.pipeline_mode<synchronous>, transform_indices = @transform_3, window_bounds = array<i64: 1, 1>}]} {
    %c0_i32 = arith.constant 0 : i32
    %0 = arith.cmpi eq, %arg0, %c0_i32 : i32
    %1 = arith.extui %0 : i1 to i32
    %c0_i32_0 = arith.constant 0 : i32
    %2 = arith.cmpi ne, %1, %c0_i32_0 : i32
    scf.if %2 {
      %cst_22 = arith.constant 0.000000e+00 : f32
      %58 = vector.broadcast %cst_22 : f32 to vector<1x1xf32>
      %c0_23 = arith.constant 0 : index
      %c0_24 = arith.constant 0 : index
      %59 = vector.load %arg4[%c0_23, %c0_24] : memref<1x1xf32, #tpu.memory_space<vmem>>, vector<1x1xf32>
      tpu.vector_store %arg4[%c0_23, %c0_24], %58 {strides = array<i32>} : memref<1x1xf32, #tpu.memory_space<vmem>>, vector<1x1xf32>,
    } else {
    }
    %c8_i32 = arith.constant 8 : i32
    %3 = arith.muli %arg0, %c8_i32 : i32
    %4 = tpu.iota {dimensions = array<i32: 0>} : vector<8x1xi32>
    %5 = vector.broadcast %3 : i32 to vector<8x1xi32>
    %6 = arith.addi %5, %4 : vector<8x1xi32>
    %c20_i32 = arith.constant 20 : i32
    %7 = vector.broadcast %c20_i32 : i32 to vector<8x1xi32>
    %8 = arith.cmpi slt, %6, %7 : vector<8x1xi32>
    %c0 = arith.constant 0 : index
    %c0_1 = arith.constant 0 : index
    %9 = vector.load %arg3[%c0, %c0_1] : memref<8x1xi32, #tpu.memory_space<vmem>>, vector<8x1xi32>
    %10 = tpu.iota {dimensions = array<i32: 1>} : vector<8x128xi32>
    %11 = vector.broadcast %9 : vector<8x1xi32> to vector<8x128xi32>
    %12 = arith.cmpi eq, %10, %11 : vector<8x128xi32>
    %c0_2 = arith.constant 0 : index
    %c0_3 = arith.constant 0 : index
    %13 = vector.load %arg4[%c0_2, %c0_3] : memref<1x1xf32, #tpu.memory_space<vmem>>, vector<1x1xf32>
    %c0_4 = arith.constant 0 : index
    %c0_5 = arith.constant 0 : index
    %14 = vector.load %arg1[%c0_4, %c0_5] : memref<8x128xf32, #tpu.memory_space<vmem>>, vector<8x128xf32>
    %cst = arith.constant dense<0xFF800000> : vector<8xf32>
    %15 = vector.multi_reduction <maximumf>, %14, %cst [1] : vector<8x128xf32> to vector<8xf32>
    %16 = vector.shape_cast %15 : vector<8xf32> to vector<8x1xf32>
    %17 = vector.broadcast %16 : vector<8x1xf32> to vector<8x128xf32>
    %18 = arith.subf %14, %17 : vector<8x128xf32>
    %19 = math.exp %18 : vector<8x128xf32>
    %cst_6 = arith.constant dense<0.000000e+00> : vector<8xf32>
    %20 = vector.multi_reduction <add>, %19, %cst_6 [1] : vector<8x128xf32> to vector<8xf32>
    %21 = vector.shape_cast %20 : vector<8xf32> to vector<8x1xf32>
    %22 = math.log %21 : vector<8x1xf32>
    %23 = arith.addf %16, %22 : vector<8x1xf32>
    %cst_7 = arith.constant 0.000000e+00 : f32
    %24 = vector.broadcast %cst_7 : f32 to vector<8x128xf32>
    %25 = arith.select %12, %14, %24 : vector<8x128xi1>, vector<8x128xf32>
    %cst_8 = arith.constant dense<0.000000e+00> : vector<8xf32>
    %26 = vector.multi_reduction <add>, %25, %cst_8 [1] : vector<8x128xf32> to vector<8xf32>
    %27 = vector.shape_cast %26 : vector<8xf32> to vector<8x1xf32>
    %28 = arith.subf %23, %27 : vector<8x1xf32>
    %cst_9 = arith.constant 0.000000e+00 : f32
    %29 = vector.broadcast %cst_9 : f32 to vector<8x1xf32>
    %30 = arith.select %8, %28, %29 : vector<8x1xi1>, vector<8x1xf32>
    %cst_10 = arith.constant dense<0.000000e+00> : vector<1xf32>
    %31 = vector.multi_reduction <add>, %30, %cst_10 [0] : vector<8x1xf32> to vector<1xf32>
    %32 = vector.shape_cast %31 : vector<1xf32> to vector<1x1xf32>
    %c0_11 = arith.constant 0 : index
    %c0_12 = arith.constant 0 : index
    %33 = vector.load %arg2[%c0_11, %c0_12] : memref<8x128xf32, #tpu.memory_space<vmem>>, vector<8x128xf32>
    %cst_13 = arith.constant dense<0xFF800000> : vector<8xf32>
    %34 = vector.multi_reduction <maximumf>, %33, %cst_13 [1] : vector<8x128xf32> to vector<8xf32>
    %35 = vector.shape_cast %34 : vector<8xf32> to vector<8x1xf32>
    %36 = vector.broadcast %35 : vector<8x1xf32> to vector<8x128xf32>
    %37 = arith.subf %33, %36 : vector<8x128xf32>
    %38 = math.exp %37 : vector<8x128xf32>
    %cst_14 = arith.constant dense<0.000000e+00> : vector<8xf32>
    %39 = vector.multi_reduction <add>, %38, %cst_14 [1] : vector<8x128xf32> to vector<8xf32>
    %40 = vector.shape_cast %39 : vector<8xf32> to vector<8x1xf32>
    %41 = math.log %40 : vector<8x1xf32>
    %42 = arith.addf %35, %41 : vector<8x1xf32>
    %cst_15 = arith.constant 0.000000e+00 : f32
    %43 = vector.broadcast %cst_15 : f32 to vector<8x128xf32>
    %44 = arith.select %12, %33, %43 : vector<8x128xi1>, vector<8x128xf32>
    %cst_16 = arith.constant dense<0.000000e+00> : vector<8xf32>
    %45 = vector.multi_reduction <add>, %44, %cst_16 [1] : vector<8x128xf32> to vector<8xf32>
    %46 = vector.shape_cast %45 : vector<8xf32> to vector<8x1xf32>
    %47 = arith.subf %42, %46 : vector<8x1xf32>
    %cst_17 = arith.constant 0.000000e+00 : f32
    %48 = vector.broadcast %cst_17 : f32 to vector<8x1xf32>
    %49 = arith.select %8, %47, %48 : vector<8x1xi1>, vector<8x1xf32>
    %cst_18 = arith.constant dense<0.000000e+00> : vector<1xf32>
    %50 = vector.multi_reduction <add>, %49, %cst_18 [0] : vector<8x1xf32> to vector<1xf32>
    %51 = vector.shape_cast %50 : vector<1xf32> to vector<1x1xf32>
    %52 = arith.addf %32, %51 : vector<1x1xf32>
    %53 = arith.addf %13, %52 : vector<1x1xf32>
    %c0_19 = arith.constant 0 : index
    %c0_20 = arith.constant 0 : index
    %54 = vector.load %arg4[%c0_19, %c0_20] : memref<1x1xf32, #tpu.memory_space<vmem>>, vector<1x1xf32>
    tpu.vector_store %arg4[%c0_19, %c0_20], %53 {strides = array<i32>} : memref<1x1xf32, #tpu.memory_space<vmem>>, vector<1x1xf32>,
    %c2_i32 = arith.constant 2 : i32
    %55 = arith.cmpi eq, %arg0, %c2_i32 : i32
    %56 = arith.extui %55 : i1 to i32
    %c0_i32_21 = arith.constant 0 : i32
    %57 = arith.cmpi ne, %56, %c0_i32_21 : i32
    scf.if %57 {
      %c0_22 = arith.constant 0 : index
      %c0_23 = arith.constant 0 : index
      %58 = vector.load %arg4[%c0_22, %c0_23] : memref<1x1xf32, #tpu.memory_space<vmem>>, vector<1x1xf32>
      %cst_24 = arith.constant 2.500000e-02 : f32
      %59 = vector.broadcast %cst_24 : f32 to vector<1x1xf32>
      %60 = arith.mulf %58, %59 : vector<1x1xf32>
      %c0_25 = arith.constant 0 : index
      %c0_26 = arith.constant 0 : index
      %61 = vector.load %arg4[%c0_25, %c0_26] : memref<1x1xf32, #tpu.memory_space<vmem>>, vector<1x1xf32>
      tpu.vector_store %arg4[%c0_25, %c0_26], %60 {strides = array<i32>} : memref<1x1xf32, #tpu.memory_space<vmem>>, vector<1x1xf32>,
    } else {
    }
    return
  }
  func.func @transform_0(%arg0: i32) -> (i32, i32) {
    %c0_i32 = arith.constant 0 : i32
    %c0_i32_0 = arith.constant 0 : i32
    return %arg0, %c0_i32 : i32, i32
  }
  func.func @transform_1(%arg0: i32) -> (i32, i32) {
    %c0_i32 = arith.constant 0 : i32
    %c0_i32_0 = arith.constant 0 : i32
    return %arg0, %c0_i32 : i32, i32
  }
  func.func @transform_2(%arg0: i32) -> (i32, i32) {
    %c0_i32 = arith.constant 0 : i32
    %c0_i32_0 = arith.constant 0 : i32
    return %arg0, %c0_i32 : i32, i32
  }
  func.func @transform_3(%arg0: i32) -> (i32, i32) {
    %c0_i32 = arith.constant 0 : i32
    %c0_i32_0 = arith.constant 0 : i32
    %c0_i32_1 = arith.constant 0 : i32
    return %c0_i32, %c0_i32_0 : i32, i32
  }
}

</mosaic_0001>

<bundles_post_ra>
// kernel: tpu_custom_call.1
= control target key start
LH: loop header
LB: loop body
LE: loop exit
PB: predicated region body
PF: predicated region fallthrough
CT: control target
= control target key end

     0   :  { %8 = vsyncpa [#allocation3], 0  ;;  %s667_s0 = inlined_call_operand.vmem [shape: f32[20,128], index: 0, kind: input, shape index: {}]   ;;  %s668_s1 = inlined_call_operand.hbm [shape: f32[20,128], index: 1, kind: input, shape index: {}]   ;;  %s669_s2 = inlined_call_operand.vmem [shape: s32[20,1], index: 2, kind: input, shape index: {}]   ;;  %s670_s3 = inlined_call_operand.hbm [shape: f32[1,1], index: 3, kind: output, shape index: {}]  }
   0x1   :  { %10 = vsyncpa [#allocation3 + $0x1], 0 }
   0x2   :  { %11 = vsyncpa [#allocation4], 0  ;;  %s563_s12 = smov 0   ;;  %s565_s13 = smov 0  }
   0x3   :  { %s567_s14 = smov 0   ;;  %s569_s15 = smov 0  }
   0x4 LB: > { %s582_s16 = sadd.s32 4294967295, %s538_s15   ;;  %s585_s17 = sadd.s32 1, %s538_s15   ;;  %s538_s15 = sphi %s569_s15, %s677_s15   ;;  %s534_s14 = sphi %s567_s14, %s676_s14   ;;  %s530_s13 = sphi %s565_s13, %s675_s13   ;;  %s526_s12 = sphi %s563_s12, %s674_s12  }
   0x5   : > { %s47_s18 = ssub.s32 %s538_s15, %s585_s17  ;;  %s50_s19 = sadd.s32 1, %s534_s14 }
   0x6   : > { %p48_p0 = scmp.eq.s32.totalorder %s47_s18, 0  ;;  %p57_p1 = scmp.ne.s32.totalorder %s534_s14, %s530_s13 }
   0x7   : > { %p58_p2 = scmp.eq.s32.totalorder %s538_s15, 0  ;;  %p63_p3 = scmp.ne.s32.totalorder %s530_s13, %s526_s12 }
   0x8   : > { %s595_s20 = scalar_select %p48_p0, %s534_s14, %s50_s19  }
   0x9   : > { %p597_p4 = por %p58_p2, %p57_p1  ;;  %p64_p5 = scmp.eq.s32.totalorder %s582_s16, 0 }
   0xa   : > { %p394_p6 = scmp.lt.s32.totalorder %s538_s15, 3  ;;  %s141_s23 = sand.u32 1, %s534_s14  }
   0xb   : > { %p603_p7 = por %p64_p5, %p63_p3  ;;  %s371_s24 = sshll.u32 %s141_s23, 3 }
   0xc   : > { %s372_s25 = sshll.u32 %s538_s15, 3  ;;  %s145_s29 = scalar_lea.vmem [#allocation2], %s371_s24 }
   0xd   : > { %s149_s28 = scalar_lea.hbm %s668_s1, %s372_s25  ;;  %s153_s30 = sshll.u32 %s145_s29, 4  ;;  %s154_s30 = int_to_ptr.vmem [resolvable:$true] %s153_s30 }
   0xe   : > { %s151_s4 = sshll.u32 %s149_s28, 4  ;;  %p614_p8 = pnand %p394_p6, %p597_p4  ;;  %s152_s4 = int_to_ptr.hbm [resolvable:$true] %s151_s4 }
   0xf   : > { %p373_p9 = scmp.ge.s32.totalorder %s538_s15, 1  ;;  %p165_p10 = scmp.lt.s32.totalorder %s538_s15, 4 }
  0x10   : > { %s142_s6 = scalar_lea.sflag [#allocation3], %s141_s23  ;;  %s442_s7 = sshra.s32 %s152_s4, 4  ;;  %s443_s7 = int_to_ptr.hbm [resolvable:$true] %s442_s7 }
  0x11   : > { %s444_s8 = scalar_lea.hbm %s443_s7, 8  ;;  %p446_p12 = pneg %p614_p8 }
  0x12   : > { %p445_p11 = scmp.ne.s32.totalorder %s443_s7, %s444_s8  ;;  %s449_s11 = scalar_lea.hbm %s668_s1, 24 }
  0x13   : > { %p450_p1 = scmp.lt.s32.totalorder %s443_s7, %s668_s1  ;;  %p451_p2 = scmp.lt.s32.totalorder %s449_s11, %s444_s8 }
  0x14   : > { %p447_p13 = pnand %p446_p12, %p445_p11 }
  0x15   : > { %p452_p3 = por %p451_p2, %p450_p1 }
  0x16   : > { %p448_p0 = pneg %p447_p13 }
  0x18   : > { %p453_p4 = pnand %p452_p3, %p448_p0 }
  0x1a   : > { %456 = shalt.err (!%p453_p4)
}
  0x1b   : > { %393 = dma.hbm_to_vmem [thread:$0]  (!%p614_p8), %s152_s4, 128, %s154_s30, %s142_s6  }
  0x1c   : > { %p166_p5 = pnand %p373_p9, %p165_p10 }
  0x1d   : > { %s171_s19 = sand.u32 (!%p166_p5), 1, %s530_s13  }
  0x1e   : > { %169 = sbr.rel (%p166_p5) target bundleno = 344 (0x158), region = 32  ;;  %s374_s21 = sshll.u32 (!%p166_p5), %s171_s19, 3 }
  0x1f   : > { %s172_s23 = scalar_lea.sflag (!%p166_p5), [#allocation3], %s171_s19  ;;  %s175_s24 = scalar_lea.vmem (!%p166_p5), [#allocation2], %s374_s21 }
  0x23   : > { %517 = dma.done.wait (%p603_p7), %s172_s23, 128  }
  0x24   : > { %519 = vsyncadd (%p603_p7), %s172_s23, 4294967168  ;;  %p202_p6 = scmp.lt.s32.totalorder %s582_s16, 2  ;;  %p377_p8 = scmp.ne.s32.totalorder %s582_s16, 0 }
  0x26   : > { %s203_s25 = scalar_select %p202_p6, %s582_s16, 2 }
  0x27   : > { %213 = sbr.rel (%p377_p8) target bundleno = 46 (0x2e), region = 40 }
  0x28   : > { %s375_s26 = sshll.u32 %s203_s25, 3 }
  0x29   : > { %s205_s28 = scalar_lea.vmem %s667_s0, %s375_s26  ;;  %s209_s4 = scalar_lea.vmem %s669_s2, %s375_s26 }
  0x2c   : > { %vm214_vm0 = vcmask 0   ;;  %v540_v0 = vmov 0.0  }
  0x2d   : > { %215 = vst.msk [vmem:[#allocation5] sm:$0x1] %vm214_vm0, %v540_v0 }
  0x2e PF: > { %v230_v1 = vld [vmem:[%s205_s28] sm:$0xff]  ;;  %v541_v3 = vmov 0   ;;  %v217_v5 = vlaneseq  ;;  %s378_s22 = sshll.u32 %s582_s16, 3  ;;  %vm276_vm3 = vcmask 0   ;;  %p379_p7 = scmp.ne.s32.totalorder %s582_s16, 2 }
  0x2f   : > { %v222_v2 = vld [vmem:[%s209_s4] sm:$0xff]  ;;  %231 = vmax.xlane.f32.xlu0 %v230_v1  ;;  %432 = vset.pattern.permute.xlu1 %v541_v3  ;;  %v219_v22 = vstv %s378_s22 }
  0x30   : > { %226 = vperm.xlu1 %432, %v222_v2   ;;  %433 = vset.pattern.permute.xlu0 %v541_v3  ;;  %v252_v4 = vld [vmem:[%s175_s24] sm:$0xff]  ;;  %v224_v6 = vand.u32 127, %v217_v5  ;;  %v218_v21 = vshrl.u32 %v217_v5, 7 }
  0x32   : > { %v220_v24 = vadd.s32 %v219_v22, %v218_v21 }
  0x34   : > { %vm221_vm2 = vcmp.lt.s32.totalorder %v220_v24, 20  ;;  %v229_v47 = vld [vmem:[#allocation5] sm:$0x1] }
  0x37   : > { %253 = vmax.xlane.f32.xlu0 %v252_v4 }
  0xa2   : > { %v232_v7 = vpop.xlane.xlu0 %231  ;;  %v227_v8 = vpop.permute.xlu1 %226 }
  0xa3   : > { %v233_v9 = vsub.f32 %v230_v1, %v232_v7  ;;  %vm228_vm1 = vcmp.eq.s32.totalorder %v224_v6, %v227_v8 }
  0xa4   : > { %v263_v10 = vsel %vm228_vm1, %v252_v4, 0.0  ;;  %v241_v17 = vsel %vm228_vm1, %v230_v1, 0.0 }
  0xa5   : > { %v234_v11 = vmul.f32 1.442695, %v233_v9  ;;  %264 = vadd.xlane.f32.xlu0 %v263_v10 }
  0xa7   : > { %434 = vpow2.f32 %v234_v11 }
  0xaa   : > { %v254_v12 = vpop.xlane.xlu0 %253 }
  0xab   : > { %v255_v13 = vsub.f32 %v252_v4, %v254_v12 }
  0xad   : > { %v435_v14 = vpop.eup %434  ;;  %v256_v15 = vmul.f32 1.442695, %v255_v13 }
  0xae   : > { %236 = vadd.xlane.f32.xlu1 %v435_v14 }
  0xaf   : > { %436 = vpow2.f32 %v256_v15 }
  0xb5   : > { %v437_v16 = vpop.eup %436 }
  0xb6   : > { %258 = vadd.xlane.f32.xlu2 %v437_v16 }
  0xbe   : > { %242 = vadd.xlane.f32.xlu2 %v241_v17 }
 0x118   : > { %v265_v30 = vpop.xlane.xlu0 %264 }
 0x121   : > { %v237_v18 = vpop.xlane.xlu1 %236 }
 0x122   : > { %438 = vlog2.f32 %v237_v18 }
 0x128   : > { %v439_v19 = vpop.eup %438 }
 0x129   : > { %v259_v20 = vpop.xlane.xlu2 %258  ;;  %v239_v23 = vmul.f32 0.6931472, %v439_v19 }
 0x12a   : > { %440 = vlog2.f32 %v259_v20 }
 0x12b   : > { %v240_v26 = vadd.f32 %v239_v23, %v232_v7 }
 0x130   : > { %v441_v25 = vpop.eup %440 }
 0x131   : > { %v261_v27 = vmul.f32 0.6931472, %v441_v25  ;;  %v243_v28 = vpop.xlane.xlu2 %242 }
 0x132   : > { %v244_v29 = vsub.f32 %v240_v26, %v243_v28 }
 0x133   : > { %v262_v31 = vadd.f32 %v261_v27, %v254_v12 }
 0x134   : > { %v245_v32 = vsel %vm221_vm2, %v244_v29, 0.0 }
 0x135   : > { %v246_v33 = vrot.slane %v245_v32, 4  ;;  %v266_v34 = vsub.f32 %v262_v31, %v265_v30 }
 0x137   : > { %v247_v35 = vadd.f32 %v246_v33, %v245_v32  ;;  %v267_v36 = vsel %vm221_vm2, %v266_v34, 0.0 }
 0x138   : > { %v268_v37 = vrot.slane %v267_v36, 4 }
 0x139   : > { %v248_v38 = vrot.slane %v247_v35, 2 }
 0x13a   : > { %v269_v39 = vadd.f32 %v268_v37, %v267_v36 }
 0x13b   : > { %v249_v40 = vadd.f32 %v248_v38, %v247_v35 }
 0x13c   : > { %v270_v41 = vrot.slane %v269_v39, 2 }
 0x13d   : > { %v250_v42 = vrot.slane %v249_v40, 1 }
 0x13e   : > { %v271_v43 = vadd.f32 %v270_v41, %v269_v39 }
 0x13f   : > { %v251_v45 = vadd.f32 %v250_v42, %v249_v40 }
 0x140   : > { %v272_v44 = vrot.slane %v271_v43, 1 }
 0x142   : > { %v273_v46 = vadd.f32 %v272_v44, %v271_v43 }
 0x144   : > { %v274_v48 = vadd.f32 %v273_v46, %v251_v45  ;;  %281 = sbr.rel (%p379_p7) target bundleno = 339 (0x153), region = 44 }
 0x146   : > { %v275_v49 = vadd.f32 %v274_v48, %v229_v47 }
 0x148   : > { %277 = vst.msk [vmem:[#allocation5] sm:$0x1] %vm276_vm3, %v275_v49 }
 0x14f   : > { %v282_v50 = vld [vmem:[#allocation5] sm:$0x1] }
 0x150   : > { %v283_v51 = vmul.f32 0.025, %v282_v50 }
 0x152   : > { %284 = vst.msk [vmem:[#allocation5] sm:$0x1] %vm276_vm3, %v283_v51 }
 0x153 PF: > { %p395_p9 = scmp.eq.s32.totalorder %s582_s16, 2  ;;  %s542_s5 = smov [#allocation5]  }
 0x154   : > { %s291_s6 = sshll.u32 %s542_s5, 4  ;;  %s293_s9 = sshll.u32 %s670_s3, 4  ;;  %s292_s6 = int_to_ptr.vmem [resolvable:$true] %s291_s6  ;;  %s294_s9 = int_to_ptr.hbm [resolvable:$true] %s293_s9 }
 0x155   : > { %387 = dma.vmem_to_hbm [thread:$0]  (%p395_p9), %s292_s6, 16, %s294_s9, [#allocation4]  }
 0x156   : > { %521 = dma.done.wait (%p395_p9), [#allocation4], 16  }
 0x157   : > { %523 = vsyncadd (%p395_p9), [#allocation4], 4294967280 }
 0x158 PF: > { %p14_p10 = scmp.ge.s32.totalorder %s585_s17, 5   ;;  %s674_s12 = smov %s530_s13 }
 0x159   : > { %s675_s13 = smov %s534_s14  ;;  %s676_s14 = smov %s595_s20 }
 0x15a   : > { %s677_s15 = smov %s585_s17  ;;  %16 = sbr.rel (!%p14_p10) target bundleno = 4 (0x4), region = 83 }
 0x15f   :  { %307 = vsyncpa [#allocation3], 1 }
 0x160   :  { %309 = vsyncpa [#allocation3 + $0x1], 1 }
 0x161   :  { %310 = vsyncpa [#allocation4], 1 }
 0x162   :  { %312 = vsyncpa [#allocation4 + $0x1], 1 }

</bundles_post_ra>
